<compile_context>
chip_gen: v7x
topology: tpu7x:2x2x1
jax: 0.10.0
libtpu: 0.0.40
codegen_flags: <defaults>
</compile_context>

<pallas_src>
import functools

import jax
import jax.numpy as jnp
from jax.experimental import pallas as pl
from jax.experimental.pallas import tpu as pltpu


def _round_up(n, m):
    return ((n + m - 1) // m) * m


# ---------------------------------------------------------------------------
# Kernel
# ---------------------------------------------------------------------------
def actor_kernel(x_ref, vecs_ref, w_ref, out_ref, *, s_pad, f1, f2, a_pad, inv_b,
                 eps=1e-5):
    """One VMEM-resident block.  vecs_ref rows:
       0:g1 1:be1 2:b1 3:g2 4:be2 5:b2 6:g3 7:be3 8:b3  (lane-padded, f32)
       w_ref rows: [0:s_pad)=W1, [s_pad:s_pad+f1)=W2, [s_pad+f1:s_pad+f1+f2)=W3 (bf16)
    """

    def batchnorm(x, gamma, beta):
        # Single pass over the batch: sum and sum-of-squares together, then
        # fold the affine into one scale/shift (biased variance, as PyTorch fwd).
        s1 = jnp.sum(x, axis=0, keepdims=True)
        s2 = jnp.sum(x * x, axis=0, keepdims=True)
        mean = s1 * inv_b
        var = s2 * inv_b - mean * mean
        scale = gamma * jax.lax.rsqrt(var + eps)
        shift = beta - mean * scale
        return x * scale + shift

    r2 = s_pad        # row offset of W2 in the packed weight slab
    r3 = s_pad + f1   # row offset of W3

    x = x_ref[...]

    # bn1 -> fc1 -> relu   (padded state cols have gamma=beta=0 -> contribute 0)
    h = batchnorm(x, vecs_ref[0:1, 0:s_pad], vecs_ref[1:2, 0:s_pad])
    h = jnp.dot(h.astype(jnp.bfloat16), w_ref[0:r2, 0:f1],
                preferred_element_type=jnp.float32)
    h = jnp.maximum(h + vecs_ref[2:3, 0:f1], 0.0)

    # bn2 -> fc2 -> relu
    h = batchnorm(h, vecs_ref[3:4, 0:f1], vecs_ref[4:5, 0:f1])
    h = jnp.dot(h.astype(jnp.bfloat16), w_ref[r2:r3, 0:f2],
                preferred_element_type=jnp.float32)
    h = jnp.maximum(h + vecs_ref[5:6, 0:f2], 0.0)

    # bn3 -> fc3 -> tanh   (padded action cols: zero weights/bias -> tanh(0)=0)
    h = batchnorm(h, vecs_ref[6:7, 0:f2], vecs_ref[7:8, 0:f2])
    h = jnp.dot(h.astype(jnp.bfloat16), w_ref[r3:r3 + f2, 0:a_pad],
                preferred_element_type=jnp.float32)
    out_ref[...] = jnp.tanh(h + vecs_ref[8:9, 0:a_pad])


# ---------------------------------------------------------------------------
# Host-side packing (done once; weights are constant across calls)
# ---------------------------------------------------------------------------
def pack_actor_params(params, state_size, action_size, fc1_units, fc2_units):
    """Pack the 9 per-feature vectors into one f32 table and the 3 weight
    matrices into one bf16 slab, all padded to 128-lane boundaries."""
    (g1, be1, w1, b1, g2, be2, w2, b2, g3, be3, w3, b3) = params
    s_pad = _round_up(state_size, 128)
    a_pad = _round_up(action_size, 128)
    lane = max(s_pad, fc1_units, fc2_units, a_pad)

    def vrow(v):
        v = jnp.reshape(jnp.asarray(v, jnp.float32), (-1,))
        return jnp.pad(v, (0, lane - v.shape[0]))

    rows = [vrow(v) for v in (g1, be1, b1, g2, be2, b2, g3, be3, b3)]
    n_rows = _round_up(len(rows), 8)
    rows += [jnp.zeros((lane,), jnp.float32)] * (n_rows - len(rows))
    vecs = jnp.stack(rows, axis=0)

    def wpad(w, rows_pad):
        r, c = w.shape
        return jnp.pad(jnp.asarray(w, jnp.float32),
                       ((0, rows_pad - r), (0, lane - c)))

    wts = jnp.concatenate(
        [wpad(w1, s_pad), wpad(w2, fc1_units), wpad(w3, fc2_units)], axis=0
    ).astype(jnp.bfloat16)
    return vecs, wts


# ---------------------------------------------------------------------------
# Wrapper
# ---------------------------------------------------------------------------
@functools.partial(
    jax.jit,
    static_argnames=("state_size", "action_size", "fc1_units", "fc2_units"))
def actor_forward(x, vecs, wts, *, state_size, action_size, fc1_units, fc2_units):
    B = x.shape[0]
    s_pad = _round_up(state_size, 128)
    a_pad = _round_up(action_size, 128)

    # Lane-dense input: pad state features once per call (tiny XLA pad).
    x_pad = jnp.pad(x.astype(jnp.float32), ((0, 0), (0, s_pad - state_size)))

    kernel = functools.partial(
        actor_kernel,
        s_pad=s_pad, f1=fc1_units, f2=fc2_units, a_pad=a_pad, inv_b=1.0 / B)

    flops = 2 * B * (s_pad * fc1_units + fc1_units * fc2_units + fc2_units * a_pad)
    transcendentals = (s_pad + fc1_units + fc2_units) + B * a_pad   # rsqrt + tanh
    bytes_accessed = (x_pad.size + vecs.size + B * a_pad) * 4 + wts.size * 2

    vmem = pl.BlockSpec(memory_space=pltpu.MemorySpace.VMEM)
    out = pl.pallas_call(
        kernel,
        out_shape=jax.ShapeDtypeStruct((B, a_pad), jnp.float32),
        in_specs=[vmem, vmem, vmem],
        out_specs=vmem,
        cost_estimate=pl.CostEstimate(
            flops=flops,
            transcendentals=transcendentals,
            bytes_accessed=bytes_accessed),
    )(x_pad, vecs, wts)
    return out[:, :action_size]


# ---------------------------------------------------------------------------
# Parameter init (mirrors the PyTorch module's shapes / ranges)
# ---------------------------------------------------------------------------
def init_actor_params(key, state_size, action_size, fc1_units=256, fc2_units=128):
    ks = jax.random.split(key, 6)

    def uniform(k, shape, lim):
        return jax.random.uniform(k, shape, jnp.float32, minval=-lim, maxval=lim)

    # hidden_init uses weight.size()[0] == out_features in PyTorch.
    lim1 = 1.0 / jnp.sqrt(jnp.float32(fc1_units))
    lim2 = 1.0 / jnp.sqrt(jnp.float32(fc2_units))

    # Weights stored pre-transposed: (in_features, out_features).
    w1 = uniform(ks[0], (state_size, fc1_units), lim1)
    b1 = uniform(ks[1], (1, fc1_units), 1.0 / jnp.sqrt(jnp.float32(state_size)))
    w2 = uniform(ks[2], (fc1_units, fc2_units), lim2)
    b2 = uniform(ks[3], (1, fc2_units), 1.0 / jnp.sqrt(jnp.float32(fc1_units)))
    w3 = uniform(ks[4], (fc2_units, action_size), 0.003)
    b3 = uniform(ks[5], (1, action_size), 1.0 / jnp.sqrt(jnp.float32(fc2_units)))

    g1, be1 = jnp.ones((1, state_size), jnp.float32), jnp.zeros((1, state_size), jnp.float32)
    g2, be2 = jnp.ones((1, fc1_units), jnp.float32), jnp.zeros((1, fc1_units), jnp.float32)
    g3, be3 = jnp.ones((1, fc2_units), jnp.float32), jnp.zeros((1, fc2_units), jnp.float32)

    return (g1, be1, w1, b1, g2, be2, w2, b2, g3, be3, w3, b3)


# ---------------------------------------------------------------------------
# References
# ---------------------------------------------------------------------------
def _batchnorm_ref(x, gamma, beta, eps=1e-5):
    mu = jnp.mean(x, axis=0, keepdims=True)
    var = jnp.mean((x - mu) * (x - mu), axis=0, keepdims=True)
    return (x - mu) * jax.lax.rsqrt(var + eps) * gamma + beta


def actor_reference(x, params):
    """Plain-JAX f32 reference matching the PyTorch forward exactly."""
    (g1, be1, w1, b1, g2, be2, w2, b2, g3, be3, w3, b3) = params
    h = _batchnorm_ref(x, g1, be1)
    h = jnp.maximum(h @ w1 + b1, 0.0)
    h = _batchnorm_ref(h, g2, be2)
    h = jnp.maximum(h @ w2 + b2, 0.0)
    h = _batchnorm_ref(h, g3, be3)
    return jnp.tanh(h @ w3 + b3)


def actor_reference_matched(x, params):
    """Mirrors the kernel's numerics (single-pass BN, bf16 matmul inputs)."""
    (g1, be1, w1, b1, g2, be2, w2, b2, g3, be3, w3, b3) = params

    def bn(x, gamma, beta, eps=1e-5):
        mean = jnp.mean(x, axis=0, keepdims=True)
        var = jnp.mean(x * x, axis=0, keepdims=True) - mean * mean
        scale = gamma * jax.lax.rsqrt(var + eps)
        return x * scale + (beta - mean * scale)

    def mm(a, w):
        return jnp.dot(a.astype(jnp.bfloat16), w.astype(jnp.bfloat16),
                       preferred_element_type=jnp.float32)

    h = bn(x, g1, be1)
    h = jnp.maximum(mm(h, w1) + b1, 0.0)
    h = bn(h, g2, be2)
    h = jnp.maximum(mm(h, w2) + b2, 0.0)
    h = bn(h, g3, be3)
    return jnp.tanh(mm(h, w3) + b3)


if __name__ == "__main__":
    batch = 8
    state_size = 32
    action_size = 4
    fc1_units = 256
    fc2_units = 128

    key = jax.random.PRNGKey(0)
    k_x, k_p = jax.random.split(key)
    x = jax.random.normal(k_x, (batch, state_size), jnp.float32)
    params = init_actor_params(k_p, state_size, action_size, fc1_units, fc2_units)

    # Pack once (weights are constant across calls in an RL loop).
    vecs, wts = pack_actor_params(params, state_size, action_size, fc1_units, fc2_units)

    out = actor_forward(
        x, vecs, wts,
        state_size=state_size, action_size=action_size,
        fc1_units=fc1_units, fc2_units=fc2_units)
    out = jax.block_until_ready(out)
    assert out.shape == (batch, action_size)

    # Tight check vs. a reference with identical numerics (catches kernel bugs).
    ref_match = actor_reference_matched(x, params)
    assert jnp.allclose(out, ref_match, atol=1e-4, rtol=1e-4), "mismatch vs matched reference"

    # Semantics check vs. the exact f32 PyTorch-style forward (bf16 matmul tolerance).
    ref_f32 = actor_reference(x, params)
    assert jnp.allclose(out, ref_f32, atol=5e-3, rtol=5e-3), "mismatch vs f32 reference"

    print("KERNEL_OK")
</pallas_src>

<mosaic_0001>
module attributes {stable_mosaic.version = 11 : i64} {
  func.func @actor_kernel(%arg0: memref<8x128xf32, #tpu.memory_space<vmem>>, %arg1: memref<16x256xf32, #tpu.memory_space<vmem>>, %arg2: memref<512x256xbf16, #tpu.memory_space<vmem>>, %arg3: memref<8x128xf32, #tpu.memory_space<vmem>>) attributes {dimension_semantics = [], scalar_prefetch = 0 : i64, scratch_operands = 0 : i64, tpu.core_type = #tpu.core_type<tc>} {
    %c0 = arith.constant 0 : index
    %c0_0 = arith.constant 0 : index
    %0 = vector.load %arg0[%c0, %c0_0] : memref<8x128xf32, #tpu.memory_space<vmem>>, vector<8x128xf32>
    %c0_1 = arith.constant 0 : index
    %c0_2 = arith.constant 0 : index
    %1 = vector.load %arg1[%c0_1, %c0_2] : memref<16x256xf32, #tpu.memory_space<vmem>>, vector<1x128xf32>
    %c1 = arith.constant 1 : index
    %c0_3 = arith.constant 0 : index
    %2 = vector.load %arg1[%c1, %c0_3] : memref<16x256xf32, #tpu.memory_space<vmem>>, vector<1x128xf32>
    %cst = arith.constant dense<0.000000e+00> : vector<128xf32>
    %3 = vector.multi_reduction <add>, %0, %cst [0] : vector<8x128xf32> to vector<128xf32>
    %4 = vector.shape_cast %3 : vector<128xf32> to vector<1x128xf32>
    %5 = arith.mulf %0, %0 : vector<8x128xf32>
    %cst_4 = arith.constant dense<0.000000e+00> : vector<128xf32>
    %6 = vector.multi_reduction <add>, %5, %cst_4 [0] : vector<8x128xf32> to vector<128xf32>
    %7 = vector.shape_cast %6 : vector<128xf32> to vector<1x128xf32>
    %cst_5 = arith.constant 1.250000e-01 : f32
    %8 = vector.broadcast %cst_5 : f32 to vector<1x128xf32>
    %9 = arith.mulf %4, %8 : vector<1x128xf32>
    %cst_6 = arith.constant 1.250000e-01 : f32
    %10 = vector.broadcast %cst_6 : f32 to vector<1x128xf32>
    %11 = arith.mulf %7, %10 : vector<1x128xf32>
    %12 = arith.mulf %9, %9 : vector<1x128xf32>
    %13 = arith.subf %11, %12 : vector<1x128xf32>
    %cst_7 = arith.constant 9.99999974E-6 : f32
    %14 = vector.broadcast %cst_7 : f32 to vector<1x128xf32>
    %15 = arith.addf %13, %14 : vector<1x128xf32>
    %16 = math.rsqrt %15 : vector<1x128xf32>
    %17 = arith.mulf %1, %16 : vector<1x128xf32>
    %18 = arith.mulf %9, %17 : vector<1x128xf32>
    %19 = arith.subf %2, %18 : vector<1x128xf32>
    %20 = vector.broadcast %17 : vector<1x128xf32> to vector<8x128xf32>
    %21 = arith.mulf %0, %20 : vector<8x128xf32>
    %22 = vector.broadcast %19 : vector<1x128xf32> to vector<8x128xf32>
    %23 = arith.addf %21, %22 : vector<8x128xf32>
    %24 = arith.truncf %23 : vector<8x128xf32> to vector<8x128xbf16>
    %c0_8 = arith.constant 0 : index
    %c0_9 = arith.constant 0 : index
    %25 = vector.load %arg2[%c0_8, %c0_9] : memref<512x256xbf16, #tpu.memory_space<vmem>>, vector<128x256xbf16>
    %cst_10 = arith.constant dense<0.000000e+00> : vector<8x256xf32>
    %26 = tpu.matmul %24, %25, %cst_10 {dimension_numbers = #tpu.dot_dimension_numbers<[1], [0], [0], [1], [0, 0, 1, 1], [], []>} : vector<8x128xbf16>, vector<128x256xbf16>, vector<8x256xf32> -> vector<8x256xf32>
    %c2 = arith.constant 2 : index
    %c0_11 = arith.constant 0 : index
    %27 = vector.load %arg1[%c2, %c0_11] : memref<16x256xf32, #tpu.memory_space<vmem>>, vector<1x256xf32>
    %28 = vector.broadcast %27 : vector<1x256xf32> to vector<8x256xf32>
    %29 = arith.addf %26, %28 : vector<8x256xf32>
    %cst_12 = arith.constant 0.000000e+00 : f32
    %30 = vector.broadcast %cst_12 : f32 to vector<8x256xf32>
    %31 = arith.maximumf %29, %30 : vector<8x256xf32>
    %c3 = arith.constant 3 : index
    %c0_13 = arith.constant 0 : index
    %32 = vector.load %arg1[%c3, %c0_13] : memref<16x256xf32, #tpu.memory_space<vmem>>, vector<1x256xf32>
    %c4 = arith.constant 4 : index
    %c0_14 = arith.constant 0 : index
    %33 = vector.load %arg1[%c4, %c0_14] : memref<16x256xf32, #tpu.memory_space<vmem>>, vector<1x256xf32>
    %cst_15 = arith.constant dense<0.000000e+00> : vector<256xf32>
    %34 = vector.multi_reduction <add>, %31, %cst_15 [0] : vector<8x256xf32> to vector<256xf32>
    %35 = vector.shape_cast %34 : vector<256xf32> to vector<1x256xf32>
    %36 = arith.mulf %31, %31 : vector<8x256xf32>
    %cst_16 = arith.constant dense<0.000000e+00> : vector<256xf32>
    %37 = vector.multi_reduction <add>, %36, %cst_16 [0] : vector<8x256xf32> to vector<256xf32>
    %38 = vector.shape_cast %37 : vector<256xf32> to vector<1x256xf32>
    %cst_17 = arith.constant 1.250000e-01 : f32
    %39 = vector.broadcast %cst_17 : f32 to vector<1x256xf32>
    %40 = arith.mulf %35, %39 : vector<1x256xf32>
    %cst_18 = arith.constant 1.250000e-01 : f32
    %41 = vector.broadcast %cst_18 : f32 to vector<1x256xf32>
    %42 = arith.mulf %38, %41 : vector<1x256xf32>
    %43 = arith.mulf %40, %40 : vector<1x256xf32>
    %44 = arith.subf %42, %43 : vector<1x256xf32>
    %cst_19 = arith.constant 9.99999974E-6 : f32
    %45 = vector.broadcast %cst_19 : f32 to vector<1x256xf32>
    %46 = arith.addf %44, %45 : vector<1x256xf32>
    %47 = math.rsqrt %46 : vector<1x256xf32>
    %48 = arith.mulf %32, %47 : vector<1x256xf32>
    %49 = arith.mulf %40, %48 : vector<1x256xf32>
    %50 = arith.subf %33, %49 : vector<1x256xf32>
    %51 = vector.broadcast %48 : vector<1x256xf32> to vector<8x256xf32>
    %52 = arith.mulf %31, %51 : vector<8x256xf32>
    %53 = vector.broadcast %50 : vector<1x256xf32> to vector<8x256xf32>
    %54 = arith.addf %52, %53 : vector<8x256xf32>
    %55 = arith.truncf %54 : vector<8x256xf32> to vector<8x256xbf16>
    %c128 = arith.constant 128 : index
    %c0_20 = arith.constant 0 : index
    %56 = vector.load %arg2[%c128, %c0_20] : memref<512x256xbf16, #tpu.memory_space<vmem>>, vector<256x128xbf16>
    %cst_21 = arith.constant dense<0.000000e+00> : vector<8x128xf32>
    %57 = tpu.matmul %55, %56, %cst_21 {dimension_numbers = #tpu.dot_dimension_numbers<[1], [0], [0], [1], [0, 0, 1, 1], [], []>} : vector<8x256xbf16>, vector<256x128xbf16>, vector<8x128xf32> -> vector<8x128xf32>
    %c5 = arith.constant 5 : index
    %c0_22 = arith.constant 0 : index
    %58 = vector.load %arg1[%c5, %c0_22] : memref<16x256xf32, #tpu.memory_space<vmem>>, vector<1x128xf32>
    %59 = vector.broadcast %58 : vector<1x128xf32> to vector<8x128xf32>
    %60 = arith.addf %57, %59 : vector<8x128xf32>
    %cst_23 = arith.constant 0.000000e+00 : f32
    %61 = vector.broadcast %cst_23 : f32 to vector<8x128xf32>
    %62 = arith.maximumf %60, %61 : vector<8x128xf32>
    %c6 = arith.constant 6 : index
    %c0_24 = arith.constant 0 : index
    %63 = vector.load %arg1[%c6, %c0_24] : memref<16x256xf32, #tpu.memory_space<vmem>>, vector<1x128xf32>
    %c7 = arith.constant 7 : index
    %c0_25 = arith.constant 0 : index
    %64 = vector.load %arg1[%c7, %c0_25] : memref<16x256xf32, #tpu.memory_space<vmem>>, vector<1x128xf32>
    %cst_26 = arith.constant dense<0.000000e+00> : vector<128xf32>
    %65 = vector.multi_reduction <add>, %62, %cst_26 [0] : vector<8x128xf32> to vector<128xf32>
    %66 = vector.shape_cast %65 : vector<128xf32> to vector<1x128xf32>
    %67 = arith.mulf %62, %62 : vector<8x128xf32>
    %cst_27 = arith.constant dense<0.000000e+00> : vector<128xf32>
    %68 = vector.multi_reduction <add>, %67, %cst_27 [0] : vector<8x128xf32> to vector<128xf32>
    %69 = vector.shape_cast %68 : vector<128xf32> to vector<1x128xf32>
    %cst_28 = arith.constant 1.250000e-01 : f32
    %70 = vector.broadcast %cst_28 : f32 to vector<1x128xf32>
    %71 = arith.mulf %66, %70 : vector<1x128xf32>
    %cst_29 = arith.constant 1.250000e-01 : f32
    %72 = vector.broadcast %cst_29 : f32 to vector<1x128xf32>
    %73 = arith.mulf %69, %72 : vector<1x128xf32>
    %74 = arith.mulf %71, %71 : vector<1x128xf32>
    %75 = arith.subf %73, %74 : vector<1x128xf32>
    %cst_30 = arith.constant 9.99999974E-6 : f32
    %76 = vector.broadcast %cst_30 : f32 to vector<1x128xf32>
    %77 = arith.addf %75, %76 : vector<1x128xf32>
    %78 = math.rsqrt %77 : vector<1x128xf32>
    %79 = arith.mulf %63, %78 : vector<1x128xf32>
    %80 = arith.mulf %71, %79 : vector<1x128xf32>
    %81 = arith.subf %64, %80 : vector<1x128xf32>
    %82 = vector.broadcast %79 : vector<1x128xf32> to vector<8x128xf32>
    %83 = arith.mulf %62, %82 : vector<8x128xf32>
    %84 = vector.broadcast %81 : vector<1x128xf32> to vector<8x128xf32>
    %85 = arith.addf %83, %84 : vector<8x128xf32>
    %86 = arith.truncf %85 : vector<8x128xf32> to vector<8x128xbf16>
    %c384 = arith.constant 384 : index
    %c0_31 = arith.constant 0 : index
    %87 = vector.load %arg2[%c384, %c0_31] : memref<512x256xbf16, #tpu.memory_space<vmem>>, vector<128x128xbf16>
    %cst_32 = arith.constant dense<0.000000e+00> : vector<8x128xf32>
    %88 = tpu.matmul %86, %87, %cst_32 {dimension_numbers = #tpu.dot_dimension_numbers<[1], [0], [0], [1], [0, 0, 1, 1], [], []>} : vector<8x128xbf16>, vector<128x128xbf16>, vector<8x128xf32> -> vector<8x128xf32>
    %c8 = arith.constant 8 : index
    %c0_33 = arith.constant 0 : index
    %89 = vector.load %arg1[%c8, %c0_33] : memref<16x256xf32, #tpu.memory_space<vmem>>, vector<1x128xf32>
    %90 = vector.broadcast %89 : vector<1x128xf32> to vector<8x128xf32>
    %91 = arith.addf %88, %90 : vector<8x128xf32>
    %92 = math.tanh %91 : vector<8x128xf32>
    %c0_34 = arith.constant 0 : index
    %c0_35 = arith.constant 0 : index
    %93 = vector.load %arg3[%c0_34, %c0_35] : memref<8x128xf32, #tpu.memory_space<vmem>>, vector<8x128xf32>
    tpu.vector_store %arg3[%c0_34, %c0_35], %92 {strides = array<i32>} : memref<8x128xf32, #tpu.memory_space<vmem>>, vector<8x128xf32>,
    return
  }
}

</mosaic_0001>

<bundles_post_ra>
// kernel: actor_forward.1
= control target key start
LH: loop header
LB: loop body
LE: loop exit
PB: predicated region body
PF: predicated region fallthrough
CT: control target
= control target key end

     0   :  { %8 = vsyncpa [#allocation3], 0  ;;  %s920_s0 = inlined_call_operand.vmem [shape: f32[8,128], index: 0, kind: input, shape index: {}]   ;;  %s921_s1 = inlined_call_operand.hbm [shape: f32[16,256], index: 1, kind: input, shape index: {}]   ;;  %s922_s2 = inlined_call_operand.hbm [shape: bf16[512,256], index: 2, kind: input, shape index: {}]   ;;  %s923_s3 = inlined_call_operand.vmem [shape: f32[8,128], index: 3, kind: output, shape index: {}]  }
   0x1   :  { %9 = vsyncpa [#allocation5], 0  ;;  %s850_s12 = smov [#allocation2]   ;;  %s802_s16 = scalar_lea.hbm %s921_s1, 512 }
   0x2   :  { %s17_s13 = sshll.u32 %s850_s12, 4  ;;  %p803_p0 = scmp.ne.s32.totalorder %s921_s1, %s802_s16  ;;  %s18_s13 = int_to_ptr.vmem [resolvable:$true] %s17_s13 }
   0x3   :  { %p806_p1 = scmp.lt.u32.totalorder %s802_s16, %s921_s1 }
   0x5   :  { %p808_p2 = pnand %p806_p1, %p803_p0 }
   0x7   :  { %811 = shalt.err (!%p808_p2)
}
   0x8   :  { %s812_s21 = scalar_lea.vmem %s18_s13, 512  ;;  %p817_p4 = scmp.lt.s32.totalorder %s18_s13, %s18_s13 }
   0x9   :  { %p813_p3 = scmp.ne.s32.totalorder %s18_s13, %s812_s21  ;;  %p818_p5 = scmp.lt.s32.totalorder %s812_s21, %s812_s21 }
   0xb   :  { %p819_p6 = por %p818_p5, %p817_p4 }
   0xd   :  { %p820_p7 = pnand %p819_p6, %p813_p3 }
   0xf   :  { %823 = shalt.err (!%p820_p7)
}
  0x10   :  { %s851_s22 = smov 256   ;;  %s852_s23 = smov 16  }
  0x11   :  { %23 = dma.hbm_to_vmem [thread:$0]  %s921_s1, 512, %s18_s13, [#allocation3], %s851_s22, %s851_s22, %s852_s23  }
  0x12   :  { %s853_s26 = smov [#allocation4]   ;;  %s824_s30 = scalar_lea.hbm %s922_s2, 8192 }
  0x13   :  { %s29_s27 = sshll.u32 %s853_s26, 4  ;;  %p825_p8 = scmp.ne.s32.totalorder %s922_s2, %s824_s30  ;;  %s30_s27 = int_to_ptr.vmem [resolvable:$true] %s29_s27 }
  0x14   :  { %p828_p9 = scmp.lt.u32.totalorder %s824_s30, %s922_s2 }
  0x16   :  { %p830_p10 = pnand %p828_p9, %p825_p8 }
  0x18   :  { %833 = shalt.err (!%p830_p10)
}
  0x19   :  { %s834_s8 = scalar_lea.vmem %s30_s27, 8192  ;;  %p839_p12 = scmp.lt.s32.totalorder %s30_s27, %s30_s27 }
  0x1a   :  { %p835_p11 = scmp.ne.s32.totalorder %s30_s27, %s834_s8  ;;  %p840_p13 = scmp.lt.s32.totalorder %s834_s8, %s834_s8 }
  0x1c   :  { %p841_p0 = por %p840_p13, %p839_p12 }
  0x1e   :  { %p842_p1 = pnand %p841_p0, %p835_p11 }
  0x20   :  { %845 = shalt.err (!%p842_p1)
}
  0x21   :  { %s854_s1 = smov 128   ;;  %s855_s9 = smov 8  }
  0x22   :  { %35 = dma.hbm_to_vmem [thread:$0]  %s922_s2, 8192, %s30_s27, [#allocation5], %s854_s1, %s854_s1, %s855_s9  }
  0x23   :  { %846 = dma.done.wait [#allocation3], 512  }
  0x24   :  { %847 = vsyncadd [#allocation3], 4294966784 }
  0x25   :  { %848 = dma.done.wait [#allocation5], 8192  }
  0x26   :  { %849 = vsyncadd [#allocation5], 4294959104  ;;  %v856_v0 = vmov 0   ;;  %v744_v1 = vld [vmem:[#allocation4 + $0x4] ss:$8 sps:$4 sm:$0xff]   ;;  %v90_v61 = vlaneseq  ;;  %vm859_vm0 = vmmov 0  }
  0x27   :  { %212 = vmatprep.mubr.bf16.mxu0 %v856_v0  ;;  %v746_v2 = vld [vmem:[#allocation4] ss:$8 sps:$4 sm:$0xff]   ;;  %180 = vmatprep.subr.bf16.mxu0 %v744_v1  ;;  %v747_v3 = vld [vmem:[#allocation4 + $0x14] ss:$8 sps:$4 sm:$0xff]   ;;  %v749_v4 = vld [vmem:[#allocation4 + $0x10] ss:$8 sps:$4 sm:$0xff]  }
  0x28   :  { %181 = vmatpush1.bf16.msra.mxu0 %v746_v2  ;;  %v750_v5 = vld [vmem:[#allocation4 + $0x24] ss:$8 sps:$4 sm:$0xff]   ;;  %v752_v6 = vld [vmem:[#allocation4 + $0x20] ss:$8 sps:$4 sm:$0xff]   ;;  %v753_v7 = vld [vmem:[#allocation4 + $0x34] ss:$8 sps:$4 sm:$0xff]  }
  0x29   :  { %182 = vmatprep.subr.bf16.mxu0 %v747_v3  ;;  %v43_v8 = vld [vmem:[%s920_s0] sm:$0xff]  ;;  %v755_v9 = vld [vmem:[#allocation4 + $0x30] ss:$8 sps:$4 sm:$0xff]   ;;  %v759_v16 = vld [vmem:[#allocation4 + $0x54] ss:$8 sps:$4 sm:$0xff]   ;;  %v91_v62 = vshrl.u32 %v90_v61, 7 }
  0x2a   :  { %v46_v10 = vrot.slane %v43_v8, 4  ;;  %v52_v11 = vmul.f32 %v43_v8, %v43_v8  ;;  %v756_v12 = vld [vmem:[#allocation4 + $0x44] ss:$8 sps:$4 sm:$0xff]   ;;  %v758_v13 = vld [vmem:[#allocation4 + $0x40] ss:$8 sps:$4 sm:$0xff]  }
  0x2b   :  { %v761_v19 = vld [vmem:[#allocation4 + $0x50] ss:$8 sps:$4 sm:$0xff]   ;;  %v762_v22 = vld [vmem:[#allocation4 + $0x64] ss:$8 sps:$4 sm:$0xff]   ;;  %v764_v25 = vld [vmem:[#allocation4 + $0x60] ss:$8 sps:$4 sm:$0xff]  }
  0x2c   :  { %183 = vmatpush1.bf16.msra.mxu0 %v749_v4  ;;  %v47_v14 = vadd.f32 %v46_v10, %v43_v8  ;;  %v53_v15 = vrot.slane %v52_v11, 4  ;;  %v765_v28 = vld [vmem:[#allocation4 + $0x74] ss:$8 sps:$4 sm:$0xff]   ;;  %v767_v31 = vld [vmem:[#allocation4 + $0x70] ss:$8 sps:$4 sm:$0xff]   ;;  %v907_v63 = vsub.s32 0, %v91_v62 }
  0x2d   :  { %184 = vmatprep.subr.bf16.mxu0 %v750_v5  ;;  %v44_v36 = vld [vmem:[#allocation2] ss:$0 sm:$0xff]  ;;  %v45_v39 = vld [vmem:[#allocation2 + $0x1] ss:$0 sm:$0xff]  ;;  %v770_v47 = vld [vmem:[#allocation4 + $0x110] ss:$8 sps:$4 sm:$0xff]  }
  0x2e   :  { %v48_v17 = vrot.slane %v47_v14, 2  ;;  %v54_v18 = vadd.f32 %v53_v15, %v52_v11  ;;  %v768_v45 = vld [vmem:[#allocation4 + $0x100] ss:$8 sps:$4 sm:$0xff]   ;;  %v771_v48 = vld [vmem:[#allocation4 + $0x90] ss:$8 sps:$4 sm:$0xff]   ;;  %v909_v1 = vsub.s32 1, %v91_v62 }
  0x2f   :  { %v769_v46 = vld [vmem:[#allocation4 + $0x80] ss:$8 sps:$4 sm:$0xff]   ;;  %683 = vmatprep.subr.bf16.mxu1 %v768_v45  ;;  %v774_v51 = vld [vmem:[#allocation4 + $0x130] ss:$8 sps:$4 sm:$0xff]  }
  0x30   :  { %185 = vmatpush1.bf16.msra.mxu0 %v752_v6  ;;  %v49_v20 = vadd.f32 %v48_v17, %v47_v14  ;;  %v55_v21 = vrot.slane %v54_v18, 2  ;;  %684 = vmatpush3.bf16.msra.mxu1 %v769_v46  ;;  %v772_v49 = vld [vmem:[#allocation4 + $0x120] ss:$8 sps:$4 sm:$0xff]   ;;  %v775_v52 = vld [vmem:[#allocation4 + $0xb0] ss:$8 sps:$4 sm:$0xff]  }
  0x31   :  { %186 = vmatprep.subr.bf16.mxu0 %v753_v7  ;;  %685 = vmatprep.subr.bf16.mxu1 %v770_v47  ;;  %v773_v50 = vld [vmem:[#allocation4 + $0xa0] ss:$8 sps:$4 sm:$0xff]   ;;  %v778_v55 = vld [vmem:[#allocation4 + $0x150] ss:$8 sps:$4 sm:$0xff]  }
  0x32   :  { %v50_v23 = vrot.slane %v49_v20, 1  ;;  %v56_v24 = vadd.f32 %v55_v21, %v54_v18  ;;  %v776_v53 = vld [vmem:[#allocation4 + $0x140] ss:$8 sps:$4 sm:$0xff]   ;;  %v779_v56 = vld [vmem:[#allocation4 + $0xd0] ss:$8 sps:$4 sm:$0xff]  }
  0x33   :  { %v777_v54 = vld [vmem:[#allocation4 + $0xc0] ss:$8 sps:$4 sm:$0xff]   ;;  %v782_v59 = vld [vmem:[#allocation4 + $0x170] ss:$8 sps:$4 sm:$0xff]  }
  0x34   :  { %187 = vmatpush1.bf16.msra.mxu0 %v755_v9  ;;  %v51_v26 = vadd.f32 %v50_v23, %v49_v20  ;;  %v57_v27 = vrot.slane %v56_v24, 1  ;;  %686 = vmatpush3.bf16.msra.mxu1 %v771_v48  ;;  %v780_v57 = vld [vmem:[#allocation4 + $0x160] ss:$8 sps:$4 sm:$0xff]   ;;  %v783_v60 = vld [vmem:[#allocation4 + $0xf0] ss:$8 sps:$4 sm:$0xff]  }
  0x35   :  { %188 = vmatprep.subr.bf16.mxu0 %v756_v12  ;;  %687 = vmatprep.subr.bf16.mxu1 %v772_v49  ;;  %v781_v58 = vld [vmem:[#allocation4 + $0xe0] ss:$8 sps:$4 sm:$0xff]   ;;  %v857_v48 = vmov 1966171168  }
  0x36   :  { %v58_v29 = vadd.f32 %v57_v27, %v56_v24  ;;  %v59_v30 = vmul.f32 0.125, %v51_v26  ;;  %v88_v0 = vld [vmem:[#allocation2 + $0x2] ss:$8 sm:$0x3]  ;;  %v269_v49 = vunpack.c.l.s4 %v857_v48 }
  0x37   :  { %v93_v2 = vrot.slane %v88_v0, %v907_v63  ;;  %v97_v3 = vrot.slane %v88_v0, %v909_v1 }
  0x38   :  { %189 = vmatpush1.bf16.msra.mxu0 %v758_v13  ;;  %v60_v32 = vmul.f32 0.125, %v58_v29  ;;  %v61_v33 = vmul.f32 %v59_v30, %v59_v30  ;;  %688 = vmatpush3.bf16.msra.mxu1 %v773_v50  ;;  %v270_v50 = vunpack.c.0.s8 %v269_v49 }
  0x39   :  { %190 = vmatprep.subr.bf16.mxu0 %v759_v16  ;;  %689 = vmatprep.subr.bf16.mxu1 %v774_v51 }
  0x3a   :  { %v62_v34 = vsub.f32 %v60_v32, %v61_v33 }
  0x3c   :  { %191 = vmatpush1.bf16.msra.mxu0 %v761_v19  ;;  %v63_v35 = vadd.f32 1e-05, %v62_v34  ;;  %690 = vmatpush3.bf16.msra.mxu1 %v775_v52  ;;  %v273_v52 = vsub.s32 %v270_v50, %v91_v62  ;;  %v504_v50 = vld [vmem:[#allocation2 + $0x7] ss:$0 sm:$0xff] }
  0x3d   :  { %192 = vmatprep.subr.bf16.mxu0 %v762_v22  ;;  %691 = vmatprep.subr.bf16.mxu1 %v776_v53 }
  0x3e   :  { %792 = vrsqrt.f32 %v63_v35 }
  0x40   :  { %193 = vmatpush1.bf16.msra.mxu0 %v764_v25  ;;  %692 = vmatpush3.bf16.msra.mxu1 %v777_v54 }
  0x41   :  { %194 = vmatprep.subr.bf16.mxu0 %v765_v28  ;;  %693 = vmatprep.subr.bf16.mxu1 %v778_v55 }
  0x44   :  { %195 = vmatpush1.bf16.msra.mxu0 %v767_v31  ;;  %694 = vmatpush3.bf16.msra.mxu1 %v779_v56  ;;  %v224_v56 = vld [vmem:[#allocation2 + $0x3] ss:$8 sm:$0x3] }
  0x45   :  { %695 = vmatprep.subr.bf16.mxu1 %v780_v57 }
  0x48   :  { %v793_v37 = vpop.eup %792  ;;  %696 = vmatpush3.bf16.msra.mxu1 %v781_v58 }
  0x49   :  { %v65_v38 = vmul.f32 %v793_v37, %v44_v36  ;;  %697 = vmatprep.subr.bf16.mxu1 %v782_v59 }
  0x4b   :  { %v66_v40 = vmul.f32 %v65_v38, %v59_v30  ;;  %v68_v41 = vmul.f32 %v65_v38, %v43_v8 }
  0x4c   :  { %698 = vmatpush3.bf16.msra.mxu1 %v783_v60 }
  0x4d   :  { %v67_v42 = vsub.f32 %v45_v39, %v66_v40 }
  0x4f   :  { %v69_v43 = vadd.f32 %v68_v41, %v67_v42 }
  0x51   :  { %v70_v44 = vpack.c.bf16 %v69_v43, %v69_v43 }
  0x53   :  { %213 = vmatmul.mubr.bf16.vlgmr.msra.gmra.mrb[0].mxu0 %v70_v44 }
 0x126   :  { %v214_v4 = vpop.f32.mrb[0].mxu0 }
 0x127   :  { %v215_v5 = vadd.f32 %v214_v4, %v93_v2  ;;  %v216_v6 = vpop.f32.mrb[1].mxu0 }
 0x128   :  { %v217_v7 = vadd.f32 %v216_v6, %v97_v3  ;;  %v218_v8 = vpop.f32.mrb[2].mxu0  ;;  %v226_v6 = vld [vmem:[#allocation2 + $0x4] ss:$8 sm:$0x3] }
 0x129   :  { %v221_v9 = vmax.f32 %v215_v5, 0.0  ;;  %v219_v10 = vpop.f32.mrb[3].mxu0 }
 0x12a   :  { %v222_v11 = vmax.f32 %v217_v7, 0.0 }
 0x12b   :  { %v227_v12 = vrot.slane %v221_v9, 4  ;;  %v239_v13 = vmul.f32 %v221_v9, %v221_v9 }
 0x12c   :  { %v233_v14 = vrot.slane %v222_v11, 4  ;;  %v240_v15 = vmul.f32 %v222_v11, %v222_v11 }
 0x12d   :  { %v228_v16 = vadd.f32 %v227_v12, %v221_v9  ;;  %v241_v17 = vrot.slane %v239_v13, 4 }
 0x12e   :  { %v234_v18 = vadd.f32 %v233_v14, %v222_v11  ;;  %v247_v19 = vrot.slane %v240_v15, 4 }
 0x12f   :  { %v229_v20 = vrot.slane %v228_v16, 2  ;;  %v242_v21 = vadd.f32 %v241_v17, %v239_v13  ;;  %v858_v17 = vmov 0.0  }
 0x130   :  { %v235_v22 = vrot.slane %v234_v18, 2  ;;  %v248_v23 = vadd.f32 %v247_v19, %v240_v15  ;;  %714 = vmatprep.subr.bf16.mxu0 %v858_v17  ;;  %730 = vmatprep.mubr.msk.bf16.mxu0 %vm859_vm0, %v858_v17  ;;  %v790_v19 = vld [vmem:[#allocation4 + $0x1e0] ss:$8 sps:$4 sm:$0xff]  }
 0x131   :  { %v230_v24 = vadd.f32 %v229_v20, %v228_v16  ;;  %v243_v25 = vrot.slane %v242_v21, 2  ;;  %v784_v16 = vld [vmem:[#allocation4 + $0x180] ss:$8 sps:$4 sm:$0xff]   ;;  %v791_v20 = vld [vmem:[#allocation4 + $0x1f0] ss:$8 sps:$4 sm:$0xff]  }
 0x132   :  { %v249_v26 = vrot.slane %v248_v23, 2  ;;  %v236_v27 = vadd.f32 %v235_v22, %v234_v18  ;;  %715 = vmatpush3.bf16.msra.mxu0 %v784_v16  ;;  %v789_v18 = vld [vmem:[#allocation4 + $0x1d0] ss:$8 sps:$4 sm:$0xff]   ;;  %v365_v22 = vld [vmem:[#allocation2 + $0x5] ss:$0 sm:$0xff] }
 0x133   :  { %v231_v28 = vrot.slane %v230_v24, 1  ;;  %v244_v29 = vadd.f32 %v243_v25, %v242_v21  ;;  %716 = vmatprep.subr.bf16.mxu0 %v858_v17 }
 0x134   :  { %v250_v30 = vadd.f32 %v249_v26, %v248_v23  ;;  %v237_v31 = vrot.slane %v236_v27, 1 }
 0x135   :  { %v245_v32 = vrot.slane %v244_v29, 1  ;;  %v232_v33 = vadd.f32 %v231_v28, %v230_v24 }
 0x136   :  { %v251_v34 = vrot.slane %v250_v30, 1  ;;  %v238_v35 = vadd.f32 %v237_v31, %v236_v27 }
 0x137   :  { %v246_v36 = vadd.f32 %v245_v32, %v244_v29  ;;  %v253_v37 = vmul.f32 0.125, %v232_v33 }
 0x138   :  { %v252_v38 = vadd.f32 %v251_v34, %v250_v30  ;;  %v254_v39 = vmul.f32 0.125, %v238_v35 }
 0x139   :  { %v255_v40 = vmul.f32 0.125, %v246_v36  ;;  %v257_v41 = vmul.f32 %v253_v37, %v253_v37 }
 0x13a   :  { %v256_v42 = vmul.f32 0.125, %v252_v38  ;;  %v258_v43 = vmul.f32 %v254_v39, %v254_v39 }
 0x13b   :  { %v259_v44 = vsub.f32 %v255_v40, %v257_v41 }
 0x13c   :  { %v260_v45 = vsub.f32 %v256_v42, %v258_v43 }
 0x13d   :  { %v261_v46 = vadd.f32 1e-05, %v259_v44 }
 0x13e   :  { %v262_v47 = vadd.f32 1e-05, %v260_v45 }
 0x13f   :  { %794 = vrsqrt.f32 %v261_v46 }
 0x140   :  { %796 = vrsqrt.f32 %v262_v47  ;;  %v503_v47 = vld [vmem:[#allocation2 + $0x6] ss:$0 sm:$0xff] }
 0x149   :  { %v795_v51 = vpop.eup %794 }
 0x14a   :  { %v797_v53 = vpop.eup %796 }
 0x14b   :  { %v267_v54 = vcombine.low %v795_v51, %v797_v53 }
 0x14d   :  { %v274_v55 = vrot.slane %v267_v54, %v273_v52 }
 0x14f   :  { %v281_v57 = vrot.slane %v274_v55, %v273_v52 }
 0x151   :  { %v283_v58 = vmul.f32 %v281_v57, %v224_v56  ;;  %v546_v56 = vld [vmem:[#allocation2 + $0x10] ss:$0 sm:$0xff] }
 0x153   :  { %v288_v59 = vrot.slane %v283_v58, %v907_v63  ;;  %v292_v60 = vrot.slane %v283_v58, %v909_v1 }
 0x155   :  { %v295_v61 = vmul.f32 %v288_v59, %v253_v37  ;;  %v296_v0 = vmul.f32 %v292_v60, %v254_v39  ;;  %v317_v2 = vmul.f32 %v292_v60, %v222_v11  ;;  %v316_v3 = vmul.f32 %v288_v59, %v221_v9  ;;  %v785_v9 = vld [vmem:[#allocation4 + $0x190] ss:$8 sps:$4 sm:$0xff]   ;;  %v786_v11 = vld [vmem:[#allocation4 + $0x1a0] ss:$8 sps:$4 sm:$0xff]  }
 0x156   :  { %717 = vmatpush3.bf16.msra.mxu0 %v785_v9 }
 0x157   :  { %v299_v4 = vcombine.low %v295_v61, %v296_v0  ;;  %718 = vmatprep.subr.bf16.mxu0 %v858_v17 }
 0x159   :  { %v306_v5 = vrot.slane %v299_v4, %v273_v52 }
 0x15a   :  { %719 = vmatpush3.bf16.msra.mxu0 %v786_v11 }
 0x15b   :  { %v313_v7 = vrot.slane %v306_v5, %v273_v52  ;;  %720 = vmatprep.subr.bf16.mxu0 %v858_v17 }
 0x15d   :  { %v315_v8 = vsub.f32 %v226_v6, %v313_v7 }
 0x15f   :  { %v326_v62 = vrot.slane %v315_v8, %v909_v1  ;;  %v322_v10 = vrot.slane %v315_v8, %v907_v63  ;;  %v787_v1 = vld [vmem:[#allocation4 + $0x1b0] ss:$8 sps:$4 sm:$0xff]   ;;  %v788_v63 = vld [vmem:[#allocation4 + $0x1c0] ss:$8 sps:$4 sm:$0xff]  }
 0x160   :  { %721 = vmatpush3.bf16.msra.mxu0 %v787_v1 }
 0x161   :  { %v330_v12 = vadd.f32 %v326_v62, %v317_v2  ;;  %v329_v13 = vadd.f32 %v322_v10, %v316_v3  ;;  %722 = vmatprep.subr.bf16.mxu0 %v858_v17 }
 0x163   :  { %v332_v14 = vpack.c.bf16 %v330_v12, %v330_v12  ;;  %v331_v15 = vpack.c.bf16 %v329_v13, %v329_v13 }
 0x164   :  { %723 = vmatpush3.bf16.msra.mxu0 %v788_v63 }
 0x165   :  { %494 = vmatprep.mubr.bf16.mxu1 %v332_v14  ;;  %724 = vmatprep.subr.bf16.mxu0 %v858_v17 }
 0x166   :  { %495 = vmatmul.mubr.bf16.vlgmr.msra.gmra.mrb[0].mxu1 %v331_v15 }
 0x168   :  { %725 = vmatpush3.bf16.msra.mxu0 %v789_v18 }
 0x169   :  { %726 = vmatprep.subr.bf16.mxu0 %v858_v17 }
 0x16c   :  { %727 = vmatpush3.bf16.msra.mxu0 %v790_v19 }
 0x16d   :  { %728 = vmatprep.subr.bf16.mxu0 %v858_v17 }
 0x170   :  { %729 = vmatpush3.bf16.msra.mxu0 %v791_v20 }
 0x239   :  { %v699_v21 = vpop.f32.mrb[0].mxu1 }
 0x23a   :  { %v700_v23 = vpop.f32.mrb[1].mxu1 }
 0x23b   :  { %v701_v24 = vadd.f32 %v700_v23, %v699_v21  ;;  %v702_v25 = vpop.f32.mrb[2].mxu1 }
 0x23c   :  { %v703_v26 = vpop.f32.mrb[3].mxu1 }
 0x23d   :  { %v497_v27 = vadd.f32 %v701_v24, %v365_v22 }
 0x23f   :  { %v502_v28 = vmax.f32 %v497_v27, 0.0 }
 0x241   :  { %v505_v29 = vrot.slane %v502_v28, 4  ;;  %v511_v30 = vmul.f32 %v502_v28, %v502_v28 }
 0x243   :  { %v506_v31 = vadd.f32 %v505_v29, %v502_v28  ;;  %v512_v32 = vrot.slane %v511_v30, 4 }
 0x245   :  { %v507_v33 = vrot.slane %v506_v31, 2  ;;  %v513_v34 = vadd.f32 %v512_v32, %v511_v30 }
 0x247   :  { %v508_v35 = vadd.f32 %v507_v33, %v506_v31  ;;  %v514_v36 = vrot.slane %v513_v34, 2 }
 0x249   :  { %v509_v37 = vrot.slane %v508_v35, 1  ;;  %v515_v38 = vadd.f32 %v514_v36, %v513_v34 }
 0x24b   :  { %v516_v39 = vrot.slane %v515_v38, 1  ;;  %v510_v40 = vadd.f32 %v509_v37, %v508_v35 }
 0x24d   :  { %v517_v41 = vadd.f32 %v516_v39, %v515_v38  ;;  %v518_v42 = vmul.f32 0.125, %v510_v40 }
 0x24f   :  { %v519_v43 = vmul.f32 0.125, %v517_v41  ;;  %v520_v44 = vmul.f32 %v518_v42, %v518_v42 }
 0x251   :  { %v521_v45 = vsub.f32 %v519_v43, %v520_v44 }
 0x253   :  { %v522_v46 = vadd.f32 1e-05, %v521_v45 }
 0x255   :  { %798 = vrsqrt.f32 %v522_v46 }
 0x25f   :  { %v799_v48 = vpop.eup %798 }
 0x260   :  { %v524_v49 = vmul.f32 %v799_v48, %v503_v47 }
 0x262   :  { %v525_v51 = vmul.f32 %v524_v49, %v518_v42  ;;  %v527_v53 = vmul.f32 %v524_v49, %v502_v28 }
 0x264   :  { %v526_v52 = vsub.f32 %v504_v50, %v525_v51 }
 0x266   :  { %v528_v54 = vadd.f32 %v527_v53, %v526_v52 }
 0x268   :  { %v529_v55 = vpack.c.bf16 %v528_v54, %v528_v54 }
 0x26a   :  { %731 = vmatmul.mubr.bf16.vlgmr.msra.gmra.mrb[4].mxu0 %v529_v55 }
 0x33d   :  { %v629_v57 = vpop.f32.mrb[4].mxu0 }
 0x33e   :  { %v630_v58 = vadd.f32 %v629_v57, %v546_v56  ;;  %v732_v59 = vpop.f32.mrb[5].mxu0 }
 0x33f   :  { %v632_v60 = vpop.f32.mrb[6].mxu0 }
 0x340   :  { %800 = vtanh.f32 %v630_v58  ;;  %v733_v61 = vpop.f32.mrb[7].mxu0 }
 0x34a   :  { %v801_v0 = vpop.eup %800 }
 0x34b   :  { %636 = vst [vmem:[%s923_s3] sm:$0xff] %v801_v0 }
 0x34c   :  { %641 = vsyncpa [#allocation3], 1 }
 0x34d   :  { %642 = vsyncpa [#allocation5], 1 }

</bundles_post_ra>
